<compile_context>
chip_gen: v7x
topology: tpu7x:2x2x1
jax: 0.10.0
libtpu: 0.0.40
codegen_flags: <defaults>
</compile_context>

<pallas_src>
import functools

import jax
import jax.numpy as jnp
from jax import lax
from jax.experimental import pallas as pl
from jax.experimental.pallas import tpu as pltpu


# ----------------------------------------------------------------------------
# VMEM budgeting helpers (generation-aware).
# ----------------------------------------------------------------------------
def _vmem_cap():
    """~75% of physical VMEM: ~48 MiB on v7x (64 MiB), ~96 MiB on v5e/v6e."""
    try:
        info = pltpu.get_tpu_info()
        phys = int(getattr(info, "vmem_capacity_bytes", 64 * 1024 * 1024))
    except Exception:
        phys = 64 * 1024 * 1024
    return (phys * 3) // 4


def _vmem_limit(est_bytes):
    return int(min(_vmem_cap(), max(16 * 1024 * 1024, int(1.5 * est_bytes))))


def _pick_tile(n, preferred):
    """Largest multiple of 128 that divides n and is <= preferred."""
    if n <= preferred:
        return n
    t = (preferred // 128) * 128
    while t >= 128:
        if n % t == 0:
            return t
        t -= 128
    # TODO(synk): pad S to a multiple of 128 instead of this full-extent
    #             fallback (kills pipelining / megacore split for odd S).
    return n


def _proj_vmem_bytes(tm, d_in, d_out):
    x_b = 2 * tm * d_in * 2                 # bf16 x tile, double-buffered
    w_b = 2 * d_in * 3 * d_out * 2          # bf16 fused weight (resident)
    o_b = 2 * 3 * tm * d_out * 2            # bf16 q/k/v tiles, double-buffered
    tmp = tm * 3 * d_out * 4                # f32 matmul result temporary
    return x_b + w_b + o_b + tmp


def _flash_vmem_bytes(tq, tkv, d, out_itemsize):
    q_b = 2 * tq * d * 2                    # bf16 q tile, double-buffered
    kv_b = 2 * 2 * tkv * d * 2              # bf16 k + v tiles, double-buffered
    o_b = 2 * tq * d * out_itemsize         # output tile, double-buffered
    scratch = tq * d * 4 + 2 * tq * 4       # acc + m + l (f32)
    # Compiler-materialized per-step temporaries: s (f32), p (bf16), plus
    # slack for the exp / rescale intermediates.
    temps = tq * tkv * 4 + tq * tkv * 2 + tq * tkv * 4
    return q_b + kv_b + o_b + scratch + temps


# ----------------------------------------------------------------------------
# Kernel 1: fused Q/K/V projection (one wide MXU pass, resident weight).
# ----------------------------------------------------------------------------
def _qkv_proj_kernel(x_ref, w_ref, q_ref, k_ref, v_ref, *, d_out):
    # x and w arrive already in bf16; one (tm, 3*d_out) matmul with f32
    # accumulation, then lane-aligned (128-boundary) slices into Q/K/V.
    qkv = jnp.dot(x_ref[...], w_ref[...],
                  preferred_element_type=jnp.float32)      # (tm, 3*d_out) f32
    q_ref[...] = qkv[:, :d_out].astype(q_ref.dtype)        # already pre-scaled
    k_ref[...] = qkv[:, d_out:2 * d_out].astype(k_ref.dtype)
    v_ref[...] = qkv[:, 2 * d_out:].astype(v_ref.dtype)


def qkv_projection(x_bf16, w_qkv_bf16, d_out, *, row_tile=256):
    S, d_in = x_bf16.shape
    tm = _pick_tile(S, row_tile)
    out_sds = jax.ShapeDtypeStruct((S, d_out), jnp.bfloat16)
    est = _proj_vmem_bytes(tm, d_in, d_out)

    return pl.pallas_call(
        functools.partial(_qkv_proj_kernel, d_out=d_out),
        out_shape=(out_sds, out_sds, out_sds),
        grid_spec=pltpu.PrefetchScalarGridSpec(
            num_scalar_prefetch=0,
            grid=(S // tm,),
            in_specs=[
                pl.BlockSpec((tm, d_in), lambda i: (i, 0)),
                pl.BlockSpec((d_in, 3 * d_out), lambda i: (0, 0)),  # resident
            ],
            out_specs=(
                pl.BlockSpec((tm, d_out), lambda i: (i, 0)),
                pl.BlockSpec((tm, d_out), lambda i: (i, 0)),
                pl.BlockSpec((tm, d_out), lambda i: (i, 0)),
            ),
        ),
        compiler_params=pltpu.CompilerParams(
            dimension_semantics=("parallel",),
            vmem_limit_bytes=_vmem_limit(est),
        ),
    )(x_bf16, w_qkv_bf16)


# ----------------------------------------------------------------------------
# Kernel 2: flash attention (online softmax; kv reduction axis is last).
# ----------------------------------------------------------------------------
def _flash_attn_kernel(q_ref, k_ref, v_ref, o_ref, m_scr, l_scr, acc_scr):
    kv = pl.program_id(1)

    @pl.when(kv == 0)
    def _init():
        m_scr[...] = jnp.full_like(m_scr, -jnp.inf)
        l_scr[...] = jnp.zeros_like(l_scr)
        acc_scr[...] = jnp.zeros_like(acc_scr)

    q = q_ref[...]            # (tq, d)  bf16, already scaled by 1/sqrt(d_out)
    k = k_ref[...]            # (tkv, d) bf16
    v = v_ref[...]            # (tkv, d) bf16

    # scores = q @ k^T without materializing a transpose: contract the last
    # dims of q and k directly on the MXU.
    s = lax.dot_general(q, k, (((1,), (1,)), ((), ())),
                        preferred_element_type=jnp.float32)   # (tq, tkv) f32

    m_prev = m_scr[...]
    m_new = jnp.maximum(m_prev, jnp.max(s, axis=-1, keepdims=True))
    alpha = jnp.exp(m_prev - m_new)                           # f32 bookkeeping
    # bf16 exp relieves the single EUP slot (v6e/v7x bf16 EUP ~2x); bf16 p
    # feeds the PV matmul directly, dropping the separate cast.
    p = jnp.exp((s - m_new).astype(jnp.bfloat16))             # (tq, tkv) bf16

    l_scr[...] = alpha * l_scr[...] + jnp.sum(
        p.astype(jnp.float32), axis=-1, keepdims=True)
    acc_scr[...] = alpha * acc_scr[...] + jnp.dot(
        p, v, preferred_element_type=jnp.float32)
    m_scr[...] = m_new

    @pl.when(kv == pl.num_programs(1) - 1)
    def _finalize():
        inv_l = pl.reciprocal(l_scr[...], approx=True)        # EUP slot, ~free
        o_ref[...] = (acc_scr[...] * inv_l).astype(o_ref.dtype)


def flash_attention(q, k, v, out_dtype, *, q_tile=256, kv_tile=512):
    S, d = q.shape
    out_itemsize = jnp.dtype(out_dtype).itemsize
    cap = _vmem_cap()
    tq = _pick_tile(S, q_tile)

    # Keep K/V fully VMEM-resident (tkv = S, constant index_map -> fetched
    # once, reused by every q tile) when the budget allows; otherwise stream
    # kv tiles, shrinking until they fit.
    if _flash_vmem_bytes(tq, S, d, out_itemsize) <= int(0.6 * cap):
        tkv = S
    else:
        tkv = _pick_tile(S, kv_tile)
        while (tkv > 128 and
               _flash_vmem_bytes(tq, tkv, d, out_itemsize) > int(0.8 * cap)):
            new_tkv = _pick_tile(S, max(128, tkv // 2))
            if new_tkv >= tkv:
                break
            tkv = new_tkv

    est = _flash_vmem_bytes(tq, tkv, d, out_itemsize)

    return pl.pallas_call(
        _flash_attn_kernel,
        out_shape=jax.ShapeDtypeStruct((S, d), out_dtype),
        grid_spec=pltpu.PrefetchScalarGridSpec(
            num_scalar_prefetch=0,
            grid=(S // tq, S // tkv),             # reduction (kv) axis last
            in_specs=[
                pl.BlockSpec((tq, d), lambda i, j: (i, 0)),
                pl.BlockSpec((tkv, d), lambda i, j: (j, 0)),
                pl.BlockSpec((tkv, d), lambda i, j: (j, 0)),
            ],
            out_specs=pl.BlockSpec((tq, d), lambda i, j: (i, 0)),
            scratch_shapes=[
                pltpu.VMEM((tq, 1), jnp.float32),   # m: running row max
                pltpu.VMEM((tq, 1), jnp.float32),   # l: running denominator
                pltpu.VMEM((tq, d), jnp.float32),   # acc: unnormalized output
            ],
        ),
        compiler_params=pltpu.CompilerParams(
            # q axis sharded across TensorCores (v7x has 2 TCs); kv is the
            # sequential reduction.
            dimension_semantics=("parallel", "arbitrary"),
            vmem_limit_bytes=_vmem_limit(est),
        ),
    )(q, k, v)


# ----------------------------------------------------------------------------
# Host-side wrapper (module forward).
# ----------------------------------------------------------------------------
def self_attention(x, wq, wk, wv, *, row_tile=256, q_tile=256, kv_tile=512):
    """x: (S, d_in); wq/wk/wv: (d_in, d_out). Returns (S, d_out) in x.dtype."""
    d_out = wq.shape[1]
    scale = 1.0 / (d_out ** 0.5)
    # Fuse the three projections into one (d_in, 3*d_out) bf16 weight, with
    # the softmax scale folded into the wq columns; pre-cast x to bf16 so no
    # per-grid-step casts (and half the DMA bytes) inside the kernel.
    w_qkv = jnp.concatenate([wq * scale, wk, wv], axis=1).astype(jnp.bfloat16)
    x_bf16 = x.astype(jnp.bfloat16)

    q, k, v = qkv_projection(x_bf16, w_qkv, d_out, row_tile=row_tile)
    return flash_attention(q, k, v, x.dtype, q_tile=q_tile, kv_tile=kv_tile)


def self_attention_ref(x, wq, wk, wv):
    q = x @ wq
    k = x @ wk
    v = x @ wv
    scores = (q @ k.T) / (k.shape[-1] ** 0.5)
    w = jax.nn.softmax(scores, axis=-1)
    return w @ v


if __name__ == "__main__":
    key = jax.random.PRNGKey(0)
    # Lane-dense, tileable shapes (d multiple of 128; S a multiple of the
    # 256 q tile) so the flash tiling / pipelining / megacore split is
    # actually exercised.
    seq, d_in, d_out = 512, 128, 128

    kx, kq, kk, kv_key = jax.random.split(key, 4)
    x = jax.random.normal(kx, (seq, d_in), dtype=jnp.float32)
    # Deterministic "Kaiming-uniform-like" init, stored pre-transposed as
    # (d_in, d_out).
    bound = 1.0 / (d_in ** 0.5)
    wq = jax.random.uniform(kq, (d_in, d_out), jnp.float32, -bound, bound)
    wk = jax.random.uniform(kk, (d_in, d_out), jnp.float32, -bound, bound)
    wv = jax.random.uniform(kv_key, (d_in, d_out), jnp.float32, -bound, bound)

    out = jax.block_until_ready(self_attention(x, wq, wk, wv))
    ref = self_attention_ref(x, wq, wk, wv)

    assert out.shape == (seq, d_out)
    # bf16 MXU operands, bf16 softmax numerator and the approx EUP reciprocal
    # => relaxed tolerance vs the pure-f32 reference.
    max_err = float(jnp.max(jnp.abs(out - ref)))
    assert jnp.allclose(out, ref, atol=3e-2, rtol=3e-2), max_err

    print("KERNEL_OK")
</pallas_src>

<mosaic_0001>
module attributes {stable_mosaic.version = 11 : i64} {
  func.func @_qkv_proj_kernel(%arg0: i32, %arg1: memref<256x128xbf16, #tpu.memory_space<vmem>>, %arg2: memref<128x384xbf16, #tpu.memory_space<vmem>>, %arg3: memref<256x128xbf16, #tpu.memory_space<vmem>>, %arg4: memref<256x128xbf16, #tpu.memory_space<vmem>>, %arg5: memref<256x128xbf16, #tpu.memory_space<vmem>>) attributes {dimension_semantics = [#tpu.dimension_semantics<parallel>], iteration_bounds = array<i64: 2>, scalar_prefetch = 0 : i64, scratch_operands = 0 : i64, tpu.core_type = #tpu.core_type<tc>, window_params = [{transform_indices = @transform_0, window_bounds = array<i64: 256, 128>}, {pipeline_mode = #tpu.pipeline_mode<synchronous>, transform_indices = @transform_1, window_bounds = array<i64: 128, 384>}, {transform_indices = @transform_2, window_bounds = array<i64: 256, 128>}, {transform_indices = @transform_3, window_bounds = array<i64: 256, 128>}, {transform_indices = @transform_4, window_bounds = array<i64: 256, 128>}]} {
    %c0 = arith.constant 0 : index
    %c0_0 = arith.constant 0 : index
    %0 = vector.load %arg1[%c0, %c0_0] : memref<256x128xbf16, #tpu.memory_space<vmem>>, vector<256x128xbf16>
    %c0_1 = arith.constant 0 : index
    %c0_2 = arith.constant 0 : index
    %1 = vector.load %arg2[%c0_1, %c0_2] : memref<128x384xbf16, #tpu.memory_space<vmem>>, vector<128x384xbf16>
    %cst = arith.constant dense<0.000000e+00> : vector<256x384xf32>
    %2 = tpu.matmul %0, %1, %cst {dimension_numbers = #tpu.dot_dimension_numbers<[1], [0], [0], [1], [0, 0, 1, 1], [], []>} : vector<256x128xbf16>, vector<128x384xbf16>, vector<256x384xf32> -> vector<256x384xf32>
    %3 = vector.extract_strided_slice %2 {offsets = [0, 0], sizes = [256, 128], strides = [1, 1]} : vector<256x384xf32> to vector<256x128xf32>
    %4 = arith.truncf %3 : vector<256x128xf32> to vector<256x128xbf16>
    %c0_3 = arith.constant 0 : index
    %c0_4 = arith.constant 0 : index
    %5 = vector.load %arg3[%c0_3, %c0_4] : memref<256x128xbf16, #tpu.memory_space<vmem>>, vector<256x128xbf16>
    tpu.vector_store %arg3[%c0_3, %c0_4], %4 {strides = array<i32>} : memref<256x128xbf16, #tpu.memory_space<vmem>>, vector<256x128xbf16>,
    %6 = vector.extract_strided_slice %2 {offsets = [0, 128], sizes = [256, 128], strides = [1, 1]} : vector<256x384xf32> to vector<256x128xf32>
    %7 = arith.truncf %6 : vector<256x128xf32> to vector<256x128xbf16>
    %c0_5 = arith.constant 0 : index
    %c0_6 = arith.constant 0 : index
    %8 = vector.load %arg4[%c0_5, %c0_6] : memref<256x128xbf16, #tpu.memory_space<vmem>>, vector<256x128xbf16>
    tpu.vector_store %arg4[%c0_5, %c0_6], %7 {strides = array<i32>} : memref<256x128xbf16, #tpu.memory_space<vmem>>, vector<256x128xbf16>,
    %9 = vector.extract_strided_slice %2 {offsets = [0, 256], sizes = [256, 128], strides = [1, 1]} : vector<256x384xf32> to vector<256x128xf32>
    %10 = arith.truncf %9 : vector<256x128xf32> to vector<256x128xbf16>
    %c0_7 = arith.constant 0 : index
    %c0_8 = arith.constant 0 : index
    %11 = vector.load %arg5[%c0_7, %c0_8] : memref<256x128xbf16, #tpu.memory_space<vmem>>, vector<256x128xbf16>
    tpu.vector_store %arg5[%c0_7, %c0_8], %10 {strides = array<i32>} : memref<256x128xbf16, #tpu.memory_space<vmem>>, vector<256x128xbf16>,
    return
  }
  func.func @transform_0(%arg0: i32) -> (i32, i32) {
    %c0_i32 = arith.constant 0 : i32
    %c0_i32_0 = arith.constant 0 : i32
    return %arg0, %c0_i32 : i32, i32
  }
  func.func @transform_1(%arg0: i32) -> (i32, i32) {
    %c0_i32 = arith.constant 0 : i32
    %c0_i32_0 = arith.constant 0 : i32
    %c0_i32_1 = arith.constant 0 : i32
    return %c0_i32, %c0_i32_0 : i32, i32
  }
  func.func @transform_2(%arg0: i32) -> (i32, i32) {
    %c0_i32 = arith.constant 0 : i32
    %c0_i32_0 = arith.constant 0 : i32
    return %arg0, %c0_i32 : i32, i32
  }
  func.func @transform_3(%arg0: i32) -> (i32, i32) {
    %c0_i32 = arith.constant 0 : i32
    %c0_i32_0 = arith.constant 0 : i32
    return %arg0, %c0_i32 : i32, i32
  }
  func.func @transform_4(%arg0: i32) -> (i32, i32) {
    %c0_i32 = arith.constant 0 : i32
    %c0_i32_0 = arith.constant 0 : i32
    return %arg0, %c0_i32 : i32, i32
  }
}

</mosaic_0001>

<bundles_post_ra>
// kernel: tpu_custom_call.1
= control target key start
LH: loop header
LB: loop body
LE: loop exit
PB: predicated region body
PF: predicated region fallthrough
CT: control target
= control target key end

     0   :  { %10 = vsyncpa [#allocation3], 0  ;;  %s2940_s0 = inlined_call_operand.hbm [shape: bf16[512,128], index: 0, kind: input, shape index: {}]   ;;  %s2941_s1 = inlined_call_operand.hbm [shape: bf16[128,384], index: 1, kind: input, shape index: {}]   ;;  %s2942_s2 = inlined_call_operand.hbm [shape: bf16[512,128], index: 2, kind: output, shape index: {0}]   ;;  %s2943_s3 = inlined_call_operand.hbm [shape: bf16[512,128], index: 3, kind: output, shape index: {1}]   ;;  %s2944_s4 = inlined_call_operand.hbm [shape: bf16[512,128], index: 4, kind: output, shape index: {2}]  }
   0x1   :  { %12 = vsyncpa [#allocation3 + $0x1], 0 }
   0x2   :  { %13 = vsyncpa [#allocation6], 0 }
   0x3   :  { %14 = vsyncpa [#allocation4], 0 }
   0x4   :  { %16 = vsyncpa [#allocation4 + $0x1], 0 }
   0x5   :  { %17 = vsyncpa [#allocation9], 0 }
   0x6   :  { %19 = vsyncpa [#allocation9 + $0x1], 0  ;;  %s2558_s15 = smov 0   ;;  %s2560_s16 = smov 0  }
   0x7   :  { %s2562_s17 = smov 0   ;;  %s2564_s18 = smov 0  }
   0x8 LB: > { %s2579_s19 = sadd.s32 4294967295, %s2519_s18   ;;  %s2948_s20 = sadd.s32 4294967294, %s2519_s18   ;;  %s2519_s18 = sphi %s2564_s18, %s2967_s18   ;;  %s2515_s17 = sphi %s2562_s17, %s2966_s17   ;;  %s2511_s16 = sphi %s2560_s16, %s2965_s16   ;;  %s2507_s15 = sphi %s2558_s15, %s2964_s15  }
   0x9   : > { %p45_p0 = scmp.ne.s32.totalorder %s2511_s16, %s2507_s15  ;;  %p2945_p1 = scmp.eq.s32.totalorder %s2579_s19, 0 }
   0xa   : > { %p96_p3 = scmp.eq.s32.totalorder %s2948_s20, 1  ;;  %p1577_p5 = scmp.ge.s32.totalorder %s2519_s18, 1 }
   0xb   : > { %p2590_p4 = por %p2945_p1, %p45_p0  ;;  %p155_p7 = scmp.lt.s32.totalorder %s2519_s18, 3 }
   0xc   : > { %p2595_p6 = por %p96_p3, %p45_p0  ;;  %s2521_s24 = smov [#allocation5]  }
   0xd   : > { %s2949_s21 = scalar_select %p2590_p4, 1, 0 }
   0xe   : > { %s2950_s22 = scalar_select %p2595_p6, 1, 0 }
   0xf   : > { %p2600_p8 = pnand %p1577_p5, %p155_p7  ;;  %s167_s25 = sshll.u32 %s2521_s24, 4  ;;  %s2604_s25 = int_to_ptr.vmem [resolvable:$true] %s167_s25 }
  0x10   : > { %s2616_s27 = sadd.s32 1, %s2519_s18   ;;  %s32_s28 = sadd.s32 1, %s2515_s17 }
  0x11   : > { %s2951_s23 = scalar_select %p2600_p8, 1, 0 }
  0x12   : > { %p2221_p9 = pneg %p2600_p8  ;;  %s29_s29 = ssub.s32 %s2519_s18, %s2616_s27 }
  0x13   : > { %s2331_s6 = scalar_lea.hbm %s2941_s1, 3072 }
  0x14   : > { %p2611_p11 = pnand %p2221_p9, %p2945_p1  ;;  %p2332_p12 = scmp.ne.s32.totalorder %s2941_s1, %s2331_s6 }
  0x15   : > { %p2338_p5 = scmp.lt.u32.totalorder %s2331_s6, %s2941_s1 }
  0x16   : > { %p2333_p13 = pneg %p2611_p11 }
  0x18   : > { %p2334_p0 = pnand %p2333_p13, %p2332_p12 }
  0x1a   : > { %p2335_p3 = pneg %p2334_p0 }
  0x1c   : > { %p2340_p7 = pnand %p2338_p5, %p2335_p3 }
  0x1e   : > { %2343 = shalt.err (!%p2340_p7)
}
  0x1f   : > { %s2344_s11 = scalar_lea.vmem %s2604_s25, 3072  ;;  %p2352_p2 = scmp.lt.s32.totalorder %s2604_s25, %s2604_s25 }
  0x20   : > { %p2345_p9 = scmp.ne.s32.totalorder %s2604_s25, %s2344_s11  ;;  %p2353_p6 = scmp.lt.s32.totalorder %s2344_s11, %s2344_s11 }
  0x22   : > { %p2347_p10 = pnand %p2345_p9, %p2333_p13  ;;  %p2354_p4 = por %p2353_p6, %p2352_p2 }
  0x24   : > { %p2348_p1 = pneg %p2347_p10 }
  0x26   : > { %p2355_p8 = pnand %p2354_p4, %p2348_p1 }
  0x28   : > { %2358 = shalt.err (!%p2355_p8)
}
  0x29   : > { %s2522_s12 = smov 192   ;;  %s2523_s13 = smov 12  }
  0x2a   : > { %2224 = dma.hbm_to_vmem [thread:$0]  (!%p2611_p11), %s2941_s1, 3072, %s2604_s25, [#allocation6], %s2522_s12, %s2522_s12, %s2523_s13  }
  0x2b   : > { %p30_p2 = scmp.eq.s32.totalorder %s29_s29, 0  ;;  %p39_p1 = scmp.ne.s32.totalorder %s2515_s17, %s2511_s16 }
  0x2c   : > { %p40_p4 = scmp.eq.s32.totalorder %s2519_s18, 0  ;;  %p2240_p6 = scmp.lt.s32.totalorder %s2519_s18, 2 }
  0x2d   : > { %s2647_s30 = scalar_select %p30_p2, %s2515_s17, %s32_s28  }
  0x2e   : > { %p41_p8 = por %p40_p4, %p39_p1  ;;  %p2953_p10 = scmp.eq.s32.totalorder %s2579_s19, 1 }
  0x2f   : > { %s181_s6 = sand.u32 1, %s2515_s17   ;;  %s1736_s7 = sshll.u32 %s2519_s18, 11 }
  0x30   : > { %p2651_p12 = por %p2953_p10, %p39_p1  ;;  %s1580_s8 = sshll.u32 %s181_s6, 7 }
  0x31   : > { %s2660_s10 = scalar_lea.hbm %s2940_s0, %s1736_s7  ;;  %s185_s25 = scalar_lea.vmem [#allocation2], %s1580_s8 }
  0x32   : > { %s192_s28 = sshll.u32 %s185_s25, 4  ;;  %p2662_p11 = pnand %p2240_p6, %p41_p8  ;;  %s2666_s28 = int_to_ptr.vmem [resolvable:$true] %s192_s28 }
  0x33   : > { %s2668_s11 = scalar_lea.sflag [#allocation3], %s181_s6  ;;  %s2359_s12 = scalar_lea.hbm %s2660_s10, 2048 }
  0x34   : > { %p2360_p13 = scmp.ne.s32.totalorder %s2660_s10, %s2359_s12  ;;  %p2361_p0 = pneg %p2662_p11 }
  0x35   : > { %s2364_s24 = scalar_lea.hbm %s2940_s0, 4096  ;;  %p2365_p7 = scmp.lt.u32.totalorder %s2660_s10, %s2940_s0 }
  0x36   : > { %p2362_p3 = pnand %p2361_p0, %p2360_p13  ;;  %p2366_p9 = scmp.lt.u32.totalorder %s2364_s24, %s2359_s12 }
  0x37   : > { %p2368_p1 = scmp.lt.u32.totalorder %s2359_s12, %s2660_s10 }
  0x38   : > { %p2363_p5 = pneg %p2362_p3  ;;  %p2367_p2 = por %p2366_p9, %p2365_p7 }
  0x3a   : > { %p2369_p4 = por %p2368_p1, %p2367_p2 }
  0x3c   : > { %p2370_p6 = pnand %p2369_p4, %p2363_p5 }
  0x3e   : > { %2373 = shalt.err (!%p2370_p6)
}
  0x3f   : > { %s2374_s6 = scalar_lea.vmem %s2666_s28, 2048  ;;  %s2524_s26 = smov [#allocation2]  }
  0x40   : > { %p2375_p8 = scmp.ne.s32.totalorder %s2666_s28, %s2374_s6  ;;  %s2379_s9 = sshll.u32 %s2524_s26, 4  ;;  %s2380_s9 = int_to_ptr.vmem [resolvable:$false] %s2379_s9 }
  0x41   : > { %s2381_s25 = scalar_lea.vmem %s2380_s9, 4096  ;;  %p2382_p3 = scmp.lt.s32.totalorder %s2666_s28, %s2380_s9 }
  0x42   : > { %p2377_p10 = pnand %p2375_p8, %p2361_p0  ;;  %p2383_p7 = scmp.lt.s32.totalorder %s2381_s25, %s2374_s6 }
  0x44   : > { %p2378_p13 = pneg %p2377_p10  ;;  %p2384_p9 = por %p2383_p7, %p2382_p3 }
  0x46   : > { %p2385_p2 = pnand %p2384_p9, %p2378_p13 }
  0x48   : > { %2388 = shalt.err (!%p2385_p2)
}
  0x49   : > { %s2525_s12 = smov 64   ;;  %s2526_s13 = smov 4  }
  0x4a   : > { %2228 = dma.hbm_to_vmem [thread:$0]  (!%p2662_p11), %s2660_s10, 2048, %s2666_s28, %s2668_s11, %s2525_s12, %s2525_s12, %s2526_s13  }
  0x4b   : > { %p2956_p0 = scmp.ne.s32.totalorder %s2951_s23, 0 }
  0x4c   : > { %s2699_s14 = sand.u32 (!%p2956_p0), 1, %s2511_s16   ;;  %p2957_p5 = scmp.ne.s32.totalorder (!%p2956_p0), %s2949_s21, 0 }
  0x4d   : > { %204 = sbr.rel (%p2956_p0) target bundleno = 493 (0x1ed), region = 28  ;;  %s2702_s24 = sshll.u32 (!%p2956_p0), %s2699_s14, 7 }
  0x4e   : > { %s207_s7 = scalar_lea.sflag (!%p2956_p0), [#allocation3], %s2699_s14  ;;  %s2706_s8 = scalar_lea.vmem (!%p2956_p0), [#allocation2], %s2702_s24 }
  0x54   : > { %2490 = dma.done.wait (%p2957_p5), %s207_s7, 2048  }
  0x55   : > { %2492 = vsyncadd (%p2957_p5), %s207_s7, 4294965248  ;;  %p2958_p11 = scmp.eq.s32.totalorder %s2579_s19, 0 }
  0x57   : > { %2494 = dma.done.wait (%p2958_p11), [#allocation6], 3072   ;;  %p2959_p1 = pmov %p2958_p11 }
  0x58   : > { %v2527_v0 = vmov 0   ;;  %v2283_v1 = vld [vmem:[#allocation5 + $0x4] ss:$12 sps:$4 sm:$0xff]   ;;  %v2285_v2 = vld [vmem:[#allocation5] ss:$12 sps:$4 sm:$0xff]   ;;  %v2319_v30 = vld [vmem:[%s2706_s8 + $0x18] sm:$0xff]  }
  0x59   : > { %2496 = vsyncadd (%p2959_p1), [#allocation6], 4294964224  ;;  %574 = vmatprep.mubr.bf16.mxu0 %v2527_v0  ;;  %694 = vmatprep.mubr.bf16.mxu1 %v2527_v0  ;;  %v2286_v3 = vld [vmem:[#allocation5 + $0x1c] ss:$12 sps:$4 sm:$0xff]   ;;  %v2288_v4 = vld [vmem:[#allocation5 + $0x18] ss:$12 sps:$4 sm:$0xff]  }
  0x5a   : > { %542 = vmatprep.subr.bf16.mxu0 %v2283_v1  ;;  %2193 = vmatprep.subr.bf16.mxu1 %v2283_v1  ;;  %v2289_v5 = vld [vmem:[#allocation5 + $0x34] ss:$12 sps:$4 sm:$0xff]   ;;  %v2291_v6 = vld [vmem:[#allocation5 + $0x30] ss:$12 sps:$4 sm:$0xff]   ;;  %v2292_v7 = vld [vmem:[#allocation5 + $0x4c] ss:$12 sps:$4 sm:$0xff]  }
  0x5b   : > { %543 = vmatpush1.bf16.msra.mxu0 %v2285_v2  ;;  %2201 = vmatpush1.bf16.msra.mxu1 %v2285_v2  ;;  %v2294_v8 = vld [vmem:[#allocation5 + $0x48] ss:$12 sps:$4 sm:$0xff]   ;;  %v2295_v9 = vld [vmem:[#allocation5 + $0x64] ss:$12 sps:$4 sm:$0xff]   ;;  %v2297_v10 = vld [vmem:[#allocation5 + $0x60] ss:$12 sps:$4 sm:$0xff]  }
  0x5c   : > { %544 = vmatprep.subr.bf16.mxu0 %v2286_v3  ;;  %2194 = vmatprep.subr.bf16.mxu1 %v2286_v3  ;;  %v2298_v11 = vld [vmem:[#allocation5 + $0x7c] ss:$12 sps:$4 sm:$0xff]   ;;  %v2300_v12 = vld [vmem:[#allocation5 + $0x78] ss:$12 sps:$4 sm:$0xff]   ;;  %v2301_v13 = vld [vmem:[#allocation5 + $0x94] ss:$12 sps:$4 sm:$0xff]  }
  0x5d   : > { %v2303_v14 = vld [vmem:[#allocation5 + $0x90] ss:$12 sps:$4 sm:$0xff]   ;;  %v2304_v15 = vld [vmem:[#allocation5 + $0xac] ss:$12 sps:$4 sm:$0xff]   ;;  %v2306_v16 = vld [vmem:[#allocation5 + $0xa8] ss:$12 sps:$4 sm:$0xff]  }
  0x5e   : > { %v2309_v17 = vld [vmem:[#allocation5 + $0x8] ss:$12 sps:$4 sm:$0xff]   ;;  %v2307_v18 = vld [vmem:[%s2706_s8] sm:$0xff]   ;;  %v2314_v24 = vld [vmem:[#allocation5 + $0x50] ss:$12 sps:$4 sm:$0xff]   ;;  %s2757_s21 = scalar_lea.vmem [#allocation7], %s2702_s24 }
  0x5f   : > { %545 = vmatpush1.bf16.msra.mxu0 %v2288_v4  ;;  %2202 = vmatpush1.bf16.msra.mxu1 %v2288_v4  ;;  %v2720_v19 = vld [vmem:[%s2706_s8 + $0x60] sm:$0xff]   ;;  %v2311_v22 = vld [vmem:[%s2706_s8 + $0x8] sm:$0xff]   ;;  %v2315_v26 = vld [vmem:[%s2706_s8 + $0x10] sm:$0xff]   ;;  %s2762_s23 = scalar_lea.vmem [#allocation8], %s2702_s24  ;;  %s2780_s10 = scalar_lea.vmem [#allocation10], %s2702_s24 }
  0x60   : > { %546 = vmatprep.subr.bf16.mxu0 %v2289_v5  ;;  %2195 = vmatprep.subr.bf16.mxu1 %v2289_v5  ;;  %v2310_v20 = vld [vmem:[#allocation5 + $0x20] ss:$12 sps:$4 sm:$0xff]   ;;  %v2313_v21 = vld [vmem:[#allocation5 + $0x38] ss:$12 sps:$4 sm:$0xff]   ;;  %v2317_v25 = vld [vmem:[#allocation5 + $0x68] ss:$12 sps:$4 sm:$0xff]  }
  0x61   : > { %v2727_v23 = vld [vmem:[%s2706_s8 + $0x68] sm:$0xff]   ;;  %v2316_v27 = vld [vmem:[%s2706_s8 + $0x70] sm:$0xff]   ;;  %v2321_v29 = vld [vmem:[#allocation5 + $0x98] ss:$12 sps:$4 sm:$0xff]   ;;  %s1833_s29 = sshll.u32 %s2579_s19, 11  ;;  %s1400_s11 = sshll.u32 %s2757_s21, 4  ;;  %s2819_s11 = int_to_ptr.vmem [resolvable:$true] %s1400_s11 }
  0x62   : > { %v2318_v28 = vld [vmem:[#allocation5 + $0x80] ss:$12 sps:$4 sm:$0xff]   ;;  %v2320_v31 = vld [vmem:[%s2706_s8 + $0x78] sm:$0xff]   ;;  %v2325_v35 = vld [vmem:[%s2706_s8 + $0x30] sm:$0xff]   ;;  %s1416_s6 = sshll.u32 %s2762_s23, 4  ;;  %s1432_s26 = sshll.u32 %s2780_s10, 4  ;;  %s2826_s6 = int_to_ptr.vmem [resolvable:$true] %s1416_s6  ;;  %s2835_s26 = int_to_ptr.vmem [resolvable:$true] %s1432_s26 }
  0x63   : > { %547 = vmatpush1.bf16.msra.mxu0 %v2291_v6  ;;  %2203 = vmatpush1.bf16.msra.mxu1 %v2291_v6  ;;  %v2322_v32 = vld [vmem:[#allocation5 + $0xb0] ss:$12 sps:$4 sm:$0xff]   ;;  %v2323_v33 = vld [vmem:[%s2706_s8 + $0x20] sm:$0xff]   ;;  %v2324_v34 = vld [vmem:[%s2706_s8 + $0x28] sm:$0xff]   ;;  %s2817_s12 = scalar_lea.hbm %s2942_s2, %s1833_s29  ;;  %s2824_s7 = scalar_lea.hbm %s2943_s3, %s1833_s29 }
  0x64   : > { %548 = vmatprep.subr.bf16.mxu0 %v2292_v7  ;;  %2196 = vmatprep.subr.bf16.mxu1 %v2292_v7  ;;  %v2326_v36 = vld [vmem:[%s2706_s8 + $0x38] sm:$0xff]   ;;  %v2327_v37 = vld [vmem:[%s2706_s8 + $0x40] sm:$0xff]   ;;  %v2328_v38 = vld [vmem:[%s2706_s8 + $0x48] sm:$0xff]   ;;  %s2833_s25 = scalar_lea.hbm %s2944_s4, %s1833_s29  ;;  %s1377_s20 = scalar_lea.sflag [#allocation4], %s2699_s14 }
  0x65   : > { %v2329_v39 = vld [vmem:[%s2706_s8 + $0x50] sm:$0xff]   ;;  %v2330_v40 = vld [vmem:[%s2706_s8 + $0x58] sm:$0xff]   ;;  %s2389_s28 = scalar_lea.vmem %s2819_s11, 2048  ;;  %s2528_s13 = smov [#allocation7]  }
  0x66   : > { %p2390_p4 = scmp.ne.s32.totalorder %s2819_s11, %s2389_s28  ;;  %s2393_s24 = sshll.u32 %s2528_s13, 4  ;;  %s2394_s24 = int_to_ptr.vmem [resolvable:$false] %s2393_s24 }
  0x67   : > { %549 = vmatpush1.bf16.msra.mxu0 %v2294_v8  ;;  %2204 = vmatpush1.bf16.msra.mxu1 %v2294_v8  ;;  %p2396_p10 = scmp.lt.s32.totalorder %s2819_s11, %s2394_s24 }
  0x68   : > { %550 = vmatprep.subr.bf16.mxu0 %v2295_v9  ;;  %2197 = vmatprep.subr.bf16.mxu1 %v2295_v9  ;;  %p2391_p6 = pnand %p2390_p4, %p2651_p12 }
  0x6a   : > { %p2392_p8 = pneg %p2391_p6 }
  0x6b   : > { %551 = vmatpush1.bf16.msra.mxu0 %v2297_v10  ;;  %2205 = vmatpush1.bf16.msra.mxu1 %v2297_v10 }
  0x6c   : > { %552 = vmatprep.subr.bf16.mxu0 %v2298_v11  ;;  %2198 = vmatprep.subr.bf16.mxu1 %v2298_v11 }
  0x6f   : > { %553 = vmatpush1.bf16.msra.mxu0 %v2300_v12  ;;  %2206 = vmatpush1.bf16.msra.mxu1 %v2300_v12 }
  0x70   : > { %554 = vmatprep.subr.bf16.mxu0 %v2301_v13  ;;  %2199 = vmatprep.subr.bf16.mxu1 %v2301_v13 }
  0x73   : > { %555 = vmatpush1.bf16.msra.mxu0 %v2303_v14  ;;  %2207 = vmatpush1.bf16.msra.mxu1 %v2303_v14 }
  0x74   : > { %556 = vmatprep.subr.bf16.mxu0 %v2304_v15  ;;  %2200 = vmatprep.subr.bf16.mxu1 %v2304_v15 }
  0x77   : > { %557 = vmatpush1.bf16.msra.mxu0 %v2306_v16  ;;  %2208 = vmatpush1.bf16.msra.mxu1 %v2306_v16 }
  0x78   : > { %2145 = vmatprep.subr.bf16.mxu1 %v2309_v17 }
  0x7a   : > { %575 = vmatmul.mubr.bf16.vlgmr.msra.gmra.mrb[0].mxu0 %v2307_v18  ;;  %695 = vmatmul.mubr.bf16.vlgmr.msra.gmra.mrb[0].mxu1 %v2720_v19 }
  0x7b   : > { %2146 = vmatpush3.bf16.msra.mxu1 %v2309_v17  ;;  %584 = vmatprep.mubr.bf16.mxu0 %v2527_v0 }
  0x7c   : > { %2147 = vmatprep.subr.bf16.mxu1 %v2310_v20  ;;  %704 = vmatprep.mubr.bf16.mxu1 %v2527_v0 }
  0x7f   : > { %2148 = vmatpush3.bf16.msra.mxu1 %v2310_v20 }
  0x80   : > { %2149 = vmatprep.subr.bf16.mxu1 %v2313_v21 }
  0x82   : > { %585 = vmatmul.mubr.bf16.gmra.mrb[4].mxu0 %v2311_v22  ;;  %705 = vmatmul.mubr.bf16.gmra.mrb[4].mxu1 %v2727_v23 }
  0x83   : > { %2150 = vmatpush3.bf16.msra.mxu1 %v2313_v21  ;;  %594 = vmatprep.mubr.bf16.mxu0 %v2527_v0 }
  0x84   : > { %2151 = vmatprep.subr.bf16.mxu1 %v2314_v24  ;;  %714 = vmatprep.mubr.bf16.mxu1 %v2527_v0 }
  0x87   : > { %2152 = vmatpush3.bf16.msra.mxu1 %v2314_v24 }
  0x88   : > { %2153 = vmatprep.subr.bf16.mxu1 %v2317_v25 }
  0x8a   : > { %595 = vmatmul.mubr.bf16.gmra.mrb[8].mxu0 %v2315_v26  ;;  %715 = vmatmul.mubr.bf16.gmra.mrb[8].mxu1 %v2316_v27 }
  0x8b   : > { %2154 = vmatpush3.bf16.msra.mxu1 %v2317_v25  ;;  %604 = vmatprep.mubr.bf16.mxu0 %v2527_v0 }
  0x8c   : > { %2155 = vmatprep.subr.bf16.mxu1 %v2318_v28  ;;  %724 = vmatprep.mubr.bf16.mxu1 %v2527_v0 }
  0x8f   : > { %2156 = vmatpush3.bf16.msra.mxu1 %v2318_v28 }
  0x90   : > { %2157 = vmatprep.subr.bf16.mxu1 %v2321_v29 }
  0x92   : > { %605 = vmatmul.mubr.bf16.gmra.mrb[12].mxu0 %v2319_v30  ;;  %725 = vmatmul.mubr.bf16.gmra.mrb[12].mxu1 %v2320_v31 }
  0x93   : > { %2158 = vmatpush3.bf16.msra.mxu1 %v2321_v29  ;;  %614 = vmatprep.mubr.bf16.mxu0 %v2527_v0 }
  0x94   : > { %2159 = vmatprep.subr.bf16.mxu1 %v2322_v32  ;;  %2161 = vmatprep.mubr.bf16.mxu1 %v2307_v18 }
  0x97   : > { %2160 = vmatpush3.bf16.msra.mxu1 %v2322_v32 }
  0x9a   : > { %615 = vmatmul.mubr.bf16.gmra.mrb[16].mxu0 %v2323_v33  ;;  %2162 = vmatmul.mubr.bf16.vlgmr.msra.gmra.mrb[16].mxu1 %v2311_v22 }
  0x9b   : > { %624 = vmatprep.mubr.bf16.mxu0 %v2527_v0  ;;  %2165 = vmatprep.mubr.bf16.mxu1 %v2315_v26 }
  0xa2   : > { %625 = vmatmul.mubr.bf16.gmra.mrb[20].mxu0 %v2324_v34  ;;  %2166 = vmatmul.mubr.bf16.gmra.mrb[20].mxu1 %v2319_v30 }
  0xa3   : > { %634 = vmatprep.mubr.bf16.mxu0 %v2527_v0  ;;  %2169 = vmatprep.mubr.bf16.mxu1 %v2323_v33 }
  0xaa   : > { %635 = vmatmul.mubr.bf16.gmra.mrb[24].mxu0 %v2325_v35  ;;  %2170 = vmatmul.mubr.bf16.gmra.mrb[24].mxu1 %v2324_v34 }
  0xab   : > { %644 = vmatprep.mubr.bf16.mxu0 %v2527_v0  ;;  %2173 = vmatprep.mubr.bf16.mxu1 %v2325_v35 }
  0xb2   : > { %645 = vmatmul.mubr.bf16.gmra.mrb[28].mxu0 %v2326_v36  ;;  %2174 = vmatmul.mubr.bf16.gmra.mrb[28].mxu1 %v2326_v36 }
  0xb3   : > { %654 = vmatprep.mubr.bf16.mxu0 %v2527_v0  ;;  %2177 = vmatprep.mubr.bf16.mxu1 %v2327_v37 }
  0xba   : > { %655 = vmatmul.mubr.bf16.gmra.mrb[32].mxu0 %v2327_v37  ;;  %2178 = vmatmul.mubr.bf16.gmra.mrb[32].mxu1 %v2328_v38 }
  0xbb   : > { %664 = vmatprep.mubr.bf16.mxu0 %v2527_v0  ;;  %2181 = vmatprep.mubr.bf16.mxu1 %v2329_v39 }
  0xc2   : > { %665 = vmatmul.mubr.bf16.gmra.mrb[36].mxu0 %v2328_v38  ;;  %2182 = vmatmul.mubr.bf16.gmra.mrb[36].mxu1 %v2330_v40 }
  0xc3   : > { %674 = vmatprep.mubr.bf16.mxu0 %v2527_v0  ;;  %2185 = vmatprep.mubr.bf16.mxu1 %v2720_v19 }
  0xca   : > { %675 = vmatmul.mubr.bf16.gmra.mrb[40].mxu0 %v2329_v39  ;;  %2186 = vmatmul.mubr.bf16.gmra.mrb[40].mxu1 %v2727_v23 }
  0xcb   : > { %684 = vmatprep.mubr.bf16.mxu0 %v2527_v0  ;;  %2189 = vmatprep.mubr.bf16.mxu1 %v2316_v27 }
  0xd2   : > { %685 = vmatmul.mubr.bf16.gmra.mrb[44].mxu0 %v2330_v40  ;;  %2190 = vmatmul.mubr.bf16.gmra.mrb[44].mxu1 %v2320_v31 }
 0x14d   : > { %v576_v41 = vpop.f32.mrb[0].mxu0  ;;  %v696_v42 = vpop.f32.mrb[0].mxu1 }
 0x14e   : > { %v578_v43 = vpop.f32.mrb[1].mxu0  ;;  %v698_v44 = vpop.f32.mrb[1].mxu1 }
 0x14f   : > { %v580_v45 = vpop.f32.mrb[2].mxu0  ;;  %v700_v46 = vpop.f32.mrb[2].mxu1 }
 0x150   : > { %v1839_v47 = vpack.c.bf16 %v580_v45, %v576_v41  ;;  %v1899_v48 = vpack.c.bf16 %v700_v46, %v696_v42  ;;  %v582_v49 = vpop.f32.mrb[3].mxu0  ;;  %v702_v50 = vpop.f32.mrb[3].mxu1 }
 0x151   : > { %v1919_v51 = vpack.c.bf16 %v582_v49, %v578_v43  ;;  %v1979_v52 = vpack.c.bf16 %v702_v50, %v698_v44 }
 0x152   : > { %1840 = vst [vmem:[%s2757_s21] sm:$0xff] %v1839_v47   ;;  %2087 = vst [vmem:[%s2757_s21 + $0x60] sm:$0xff] %v1899_v48  }
 0x153   : > { %1920 = vst [vmem:[%s2762_s23] sm:$0xff] %v1919_v51   ;;  %2102 = vst [vmem:[%s2762_s23 + $0x60] sm:$0xff] %v1979_v52  }
 0x155   : > { %v586_v53 = vpop.f32.mrb[4].mxu0  ;;  %v706_v54 = vpop.f32.mrb[4].mxu1 }
 0x156   : > { %v588_v55 = vpop.f32.mrb[5].mxu0  ;;  %v708_v56 = vpop.f32.mrb[5].mxu1 }
 0x157   : > { %v590_v57 = vpop.f32.mrb[6].mxu0  ;;  %v710_v58 = vpop.f32.mrb[6].mxu1 }
 0x158   : > { %v1844_v59 = vpack.c.bf16 %v590_v57, %v586_v53  ;;  %v1904_v60 = vpack.c.bf16 %v710_v58, %v706_v54  ;;  %v592_v61 = vpop.f32.mrb[7].mxu0  ;;  %v712_v62 = vpop.f32.mrb[7].mxu1 }
 0x159   : > { %v1924_v63 = vpack.c.bf16 %v592_v61, %v588_v55  ;;  %v1984_v0 = vpack.c.bf16 %v712_v62, %v708_v56 }
 0x15a   : > { %2076 = vst [vmem:[%s2757_s21 + $0x8] sm:$0xff] %v1844_v59   ;;  %2088 = vst [vmem:[%s2757_s21 + $0x68] sm:$0xff] %v1904_v60  }
 0x15b   : > { %2091 = vst [vmem:[%s2762_s23 + $0x8] sm:$0xff] %v1924_v63   ;;  %2103 = vst [vmem:[%s2762_s23 + $0x68] sm:$0xff] %v1984_v0  }
 0x15d   : > { %v596_v1 = vpop.f32.mrb[8].mxu0  ;;  %v716_v2 = vpop.f32.mrb[8].mxu1 }
 0x15e   : > { %v598_v3 = vpop.f32.mrb[9].mxu0  ;;  %v718_v4 = vpop.f32.mrb[9].mxu1 }
 0x15f   : > { %v600_v5 = vpop.f32.mrb[10].mxu0  ;;  %v720_v6 = vpop.f32.mrb[10].mxu1 }
 0x160   : > { %v1849_v7 = vpack.c.bf16 %v600_v5, %v596_v1  ;;  %v1909_v8 = vpack.c.bf16 %v720_v6, %v716_v2  ;;  %v602_v9 = vpop.f32.mrb[11].mxu0  ;;  %v722_v10 = vpop.f32.mrb[11].mxu1 }
 0x161   : > { %v1929_v11 = vpack.c.bf16 %v602_v9, %v598_v3  ;;  %v1989_v12 = vpack.c.bf16 %v722_v10, %v718_v4 }
 0x162   : > { %2077 = vst [vmem:[%s2757_s21 + $0x10] sm:$0xff] %v1849_v7   ;;  %2089 = vst [vmem:[%s2757_s21 + $0x70] sm:$0xff] %v1909_v8  }
 0x163   : > { %2092 = vst [vmem:[%s2762_s23 + $0x10] sm:$0xff] %v1929_v11   ;;  %2104 = vst [vmem:[%s2762_s23 + $0x70] sm:$0xff] %v1989_v12  }
 0x165   : > { %v606_v13 = vpop.f32.mrb[12].mxu0  ;;  %v726_v14 = vpop.f32.mrb[12].mxu1 }
 0x166   : > { %v608_v15 = vpop.f32.mrb[13].mxu0  ;;  %v728_v16 = vpop.f32.mrb[13].mxu1 }
 0x167   : > { %v610_v17 = vpop.f32.mrb[14].mxu0  ;;  %v730_v18 = vpop.f32.mrb[14].mxu1 }
 0x168   : > { %v1854_v19 = vpack.c.bf16 %v610_v17, %v606_v13  ;;  %v1914_v20 = vpack.c.bf16 %v730_v18, %v726_v14  ;;  %v612_v21 = vpop.f32.mrb[15].mxu0  ;;  %v732_v22 = vpop.f32.mrb[15].mxu1 }
 0x169   : > { %v1934_v23 = vpack.c.bf16 %v612_v21, %v608_v15  ;;  %v1994_v24 = vpack.c.bf16 %v732_v22, %v728_v16 }
 0x16a   : > { %2078 = vst [vmem:[%s2757_s21 + $0x18] sm:$0xff] %v1854_v19   ;;  %2090 = vst [vmem:[%s2757_s21 + $0x78] sm:$0xff] %v1914_v20  }
 0x16b   : > { %2093 = vst [vmem:[%s2762_s23 + $0x18] sm:$0xff] %v1934_v23   ;;  %2105 = vst [vmem:[%s2762_s23 + $0x78] sm:$0xff] %v1994_v24  }
 0x16d   : > { %v616_v25 = vpop.f32.mrb[16].mxu0  ;;  %v2163_v26 = vpop.f32.mrb[16].mxu1 }
 0x16e   : > { %v618_v27 = vpop.f32.mrb[17].mxu0  ;;  %v769_v28 = vpop.f32.mrb[17].mxu1 }
 0x16f   : > { %v620_v29 = vpop.f32.mrb[18].mxu0  ;;  %v2164_v30 = vpop.f32.mrb[18].mxu1 }
 0x170   : > { %v1859_v31 = vpack.c.bf16 %v620_v29, %v616_v25  ;;  %v2004_v32 = vpack.c.bf16 %v2164_v30, %v2163_v26  ;;  %v622_v33 = vpop.f32.mrb[19].mxu0  ;;  %v772_v34 = vpop.f32.mrb[19].mxu1 }
 0x171   : > { %v1939_v35 = vpack.c.bf16 %v622_v33, %v618_v27  ;;  %v1999_v36 = vpack.c.bf16 %v772_v34, %v769_v28 }
 0x172   : > { %2079 = vst [vmem:[%s2757_s21 + $0x20] sm:$0xff] %v1859_v31   ;;  %2106 = vst [vmem:[%s2780_s10 + $0x8] sm:$0xff] %v2004_v32  }
 0x173   : > { %2094 = vst [vmem:[%s2762_s23 + $0x20] sm:$0xff] %v1939_v35   ;;  %2000 = vst [vmem:[%s2780_s10] sm:$0xff] %v1999_v36  }
 0x175   : > { %v626_v37 = vpop.f32.mrb[20].mxu0  ;;  %v2167_v38 = vpop.f32.mrb[20].mxu1 }
 0x176   : > { %v628_v39 = vpop.f32.mrb[21].mxu0  ;;  %v785_v40 = vpop.f32.mrb[21].mxu1 }
 0x177   : > { %v630_v41 = vpop.f32.mrb[22].mxu0  ;;  %v2168_v42 = vpop.f32.mrb[22].mxu1 }
 0x178   : > { %v1864_v43 = vpack.c.bf16 %v630_v41, %v626_v37  ;;  %v2014_v44 = vpack.c.bf16 %v2168_v42, %v2167_v38  ;;  %v632_v45 = vpop.f32.mrb[23].mxu0  ;;  %v788_v46 = vpop.f32.mrb[23].mxu1 }
 0x179   : > { %v1944_v47 = vpack.c.bf16 %v632_v45, %v628_v39  ;;  %v2009_v48 = vpack.c.bf16 %v788_v46, %v785_v40 }
 0x17a   : > { %2080 = vst [vmem:[%s2757_s21 + $0x28] sm:$0xff] %v1864_v43   ;;  %2108 = vst [vmem:[%s2780_s10 + $0x18] sm:$0xff] %v2014_v44  }
 0x17b   : > { %2095 = vst [vmem:[%s2762_s23 + $0x28] sm:$0xff] %v1944_v47   ;;  %2107 = vst [vmem:[%s2780_s10 + $0x10] sm:$0xff] %v2009_v48  }
 0x17d   : > { %v636_v49 = vpop.f32.mrb[24].mxu0  ;;  %v2171_v50 = vpop.f32.mrb[24].mxu1 }
 0x17e   : > { %v638_v51 = vpop.f32.mrb[25].mxu0  ;;  %v801_v52 = vpop.f32.mrb[25].mxu1 }
 0x17f   : > { %v640_v53 = vpop.f32.mrb[26].mxu0  ;;  %v2172_v54 = vpop.f32.mrb[26].mxu1 }
 0x180   : > { %v1869_v55 = vpack.c.bf16 %v640_v53, %v636_v49  ;;  %v2024_v56 = vpack.c.bf16 %v2172_v54, %v2171_v50  ;;  %v642_v57 = vpop.f32.mrb[27].mxu0  ;;  %v804_v58 = vpop.f32.mrb[27].mxu1 }
 0x181   : > { %v1949_v59 = vpack.c.bf16 %v642_v57, %v638_v51  ;;  %v2019_v60 = vpack.c.bf16 %v804_v58, %v801_v52 }
 0x182   : > { %2081 = vst [vmem:[%s2757_s21 + $0x30] sm:$0xff] %v1869_v55   ;;  %2110 = vst [vmem:[%s2780_s10 + $0x28] sm:$0xff] %v2024_v56  }
 0x183   : > { %2096 = vst [vmem:[%s2762_s23 + $0x30] sm:$0xff] %v1949_v59   ;;  %2109 = vst [vmem:[%s2780_s10 + $0x20] sm:$0xff] %v2019_v60  }
 0x185   : > { %v646_v61 = vpop.f32.mrb[28].mxu0  ;;  %v2175_v62 = vpop.f32.mrb[28].mxu1 }
 0x186   : > { %v648_v63 = vpop.f32.mrb[29].mxu0  ;;  %v817_v0 = vpop.f32.mrb[29].mxu1 }
 0x187   : > { %v650_v1 = vpop.f32.mrb[30].mxu0  ;;  %v2176_v2 = vpop.f32.mrb[30].mxu1 }
 0x188   : > { %v1874_v3 = vpack.c.bf16 %v650_v1, %v646_v61  ;;  %v2034_v4 = vpack.c.bf16 %v2176_v2, %v2175_v62  ;;  %v652_v5 = vpop.f32.mrb[31].mxu0  ;;  %v820_v6 = vpop.f32.mrb[31].mxu1 }
 0x189   : > { %v1954_v7 = vpack.c.bf16 %v652_v5, %v648_v63  ;;  %v2029_v8 = vpack.c.bf16 %v820_v6, %v817_v0 }
 0x18a   : > { %2082 = vst [vmem:[%s2757_s21 + $0x38] sm:$0xff] %v1874_v3   ;;  %2112 = vst [vmem:[%s2780_s10 + $0x38] sm:$0xff] %v2034_v4  }
 0x18b   : > { %2097 = vst [vmem:[%s2762_s23 + $0x38] sm:$0xff] %v1954_v7   ;;  %2111 = vst [vmem:[%s2780_s10 + $0x30] sm:$0xff] %v2029_v8  }
 0x18d   : > { %v656_v9 = vpop.f32.mrb[32].mxu0  ;;  %v2179_v10 = vpop.f32.mrb[32].mxu1 }
 0x18e   : > { %v658_v11 = vpop.f32.mrb[33].mxu0  ;;  %v833_v12 = vpop.f32.mrb[33].mxu1 }
 0x18f   : > { %v660_v13 = vpop.f32.mrb[34].mxu0  ;;  %v2180_v14 = vpop.f32.mrb[34].mxu1 }
 0x190   : > { %v1879_v15 = vpack.c.bf16 %v660_v13, %v656_v9  ;;  %v2044_v16 = vpack.c.bf16 %v2180_v14, %v2179_v10  ;;  %v662_v17 = vpop.f32.mrb[35].mxu0  ;;  %v836_v18 = vpop.f32.mrb[35].mxu1 }
 0x191   : > { %v1959_v19 = vpack.c.bf16 %v662_v17, %v658_v11  ;;  %v2039_v20 = vpack.c.bf16 %v836_v18, %v833_v12 }
 0x192   : > { %2083 = vst [vmem:[%s2757_s21 + $0x40] sm:$0xff] %v1879_v15   ;;  %2114 = vst [vmem:[%s2780_s10 + $0x48] sm:$0xff] %v2044_v16  }
 0x193   : > { %2098 = vst [vmem:[%s2762_s23 + $0x40] sm:$0xff] %v1959_v19   ;;  %2113 = vst [vmem:[%s2780_s10 + $0x40] sm:$0xff] %v2039_v20  }
 0x195   : > { %v666_v21 = vpop.f32.mrb[36].mxu0  ;;  %v2183_v22 = vpop.f32.mrb[36].mxu1 }
 0x196   : > { %v668_v23 = vpop.f32.mrb[37].mxu0  ;;  %v849_v24 = vpop.f32.mrb[37].mxu1 }
 0x197   : > { %v670_v25 = vpop.f32.mrb[38].mxu0  ;;  %v2184_v26 = vpop.f32.mrb[38].mxu1 }
 0x198   : > { %v1884_v27 = vpack.c.bf16 %v670_v25, %v666_v21  ;;  %v2054_v28 = vpack.c.bf16 %v2184_v26, %v2183_v22  ;;  %v672_v29 = vpop.f32.mrb[39].mxu0  ;;  %v852_v30 = vpop.f32.mrb[39].mxu1 }
 0x199   : > { %v1964_v31 = vpack.c.bf16 %v672_v29, %v668_v23  ;;  %v2049_v32 = vpack.c.bf16 %v852_v30, %v849_v24 }
 0x19a   : > { %2084 = vst [vmem:[%s2757_s21 + $0x48] sm:$0xff] %v1884_v27   ;;  %2116 = vst [vmem:[%s2780_s10 + $0x58] sm:$0xff] %v2054_v28  }
 0x19b   : > { %2099 = vst [vmem:[%s2762_s23 + $0x48] sm:$0xff] %v1964_v31   ;;  %2115 = vst [vmem:[%s2780_s10 + $0x50] sm:$0xff] %v2049_v32  }
 0x19d   : > { %v676_v33 = vpop.f32.mrb[40].mxu0  ;;  %v2187_v34 = vpop.f32.mrb[40].mxu1 }
 0x19e   : > { %v678_v35 = vpop.f32.mrb[41].mxu0  ;;  %v865_v36 = vpop.f32.mrb[41].mxu1 }
 0x19f   : > { %v680_v37 = vpop.f32.mrb[42].mxu0  ;;  %v2188_v38 = vpop.f32.mrb[42].mxu1 }
 0x1a0   : > { %v1889_v39 = vpack.c.bf16 %v680_v37, %v676_v33  ;;  %v2064_v40 = vpack.c.bf16 %v2188_v38, %v2187_v34  ;;  %v682_v41 = vpop.f32.mrb[43].mxu0  ;;  %v868_v42 = vpop.f32.mrb[43].mxu1 }
 0x1a1   : > { %v1969_v43 = vpack.c.bf16 %v682_v41, %v678_v35  ;;  %v2059_v44 = vpack.c.bf16 %v868_v42, %v865_v36 }
 0x1a2   : > { %2085 = vst [vmem:[%s2757_s21 + $0x50] sm:$0xff] %v1889_v39   ;;  %2118 = vst [vmem:[%s2780_s10 + $0x68] sm:$0xff] %v2064_v40  }
 0x1a3   : > { %2100 = vst [vmem:[%s2762_s23 + $0x50] sm:$0xff] %v1969_v43   ;;  %2117 = vst [vmem:[%s2780_s10 + $0x60] sm:$0xff] %v2059_v44  }
 0x1a5   : > { %v686_v45 = vpop.f32.mrb[44].mxu0  ;;  %v2191_v46 = vpop.f32.mrb[44].mxu1 }
 0x1a6   : > { %v688_v47 = vpop.f32.mrb[45].mxu0  ;;  %v881_v48 = vpop.f32.mrb[45].mxu1 }
 0x1a7   : > { %v690_v49 = vpop.f32.mrb[46].mxu0  ;;  %v2192_v50 = vpop.f32.mrb[46].mxu1 }
 0x1a8   : > { %v1894_v51 = vpack.c.bf16 %v690_v49, %v686_v45  ;;  %v2074_v52 = vpack.c.bf16 %v2192_v50, %v2191_v46  ;;  %v692_v53 = vpop.f32.mrb[47].mxu0  ;;  %v884_v54 = vpop.f32.mrb[47].mxu1 }
 0x1a9   : > { %v1974_v55 = vpack.c.bf16 %v692_v53, %v688_v47  ;;  %v2069_v56 = vpack.c.bf16 %v884_v54, %v881_v48 }
 0x1aa   : > { %2086 = vst [vmem:[%s2757_s21 + $0x58] sm:$0xff] %v1894_v51   ;;  %2120 = vst [vmem:[%s2780_s10 + $0x78] sm:$0xff] %v2074_v52   ;;  %s2395_s21 = scalar_lea.vmem %s2394_s24, 4096 }
 0x1ab   : > { %2101 = vst [vmem:[%s2762_s23 + $0x58] sm:$0xff] %v1974_v55   ;;  %2119 = vst [vmem:[%s2780_s10 + $0x70] sm:$0xff] %v2069_v56   ;;  %p2397_p13 = scmp.lt.s32.totalorder %s2395_s21, %s2389_s28 }
 0x1ad   : > { %p2398_p3 = por %p2397_p13, %p2396_p10 }
 0x1af   : > { %p2399_p7 = pnand %p2398_p3, %p2392_p8 }
 0x1b1   : > { %2402 = shalt.err (!%p2399_p7)
}
 0x1b2   : > { %s2403_s23 = scalar_lea.hbm %s2817_s12, 2048  ;;  %s2407_s8 = scalar_lea.hbm %s2942_s2, 4096 }
 0x1b3   : > { %p2404_p9 = scmp.ne.s32.totalorder %s2817_s12, %s2403_s23  ;;  %p2408_p5 = scmp.lt.u32.totalorder %s2817_s12, %s2942_s2 }
 0x1b4   : > { %p2409_p11 = scmp.lt.u32.totalorder %s2407_s8, %s2403_s23  ;;  %p2411_p4 = scmp.lt.u32.totalorder %s2403_s23, %s2817_s12 }
 0x1b5   : > { %p2405_p2 = pnand %p2404_p9, %p2651_p12 }
 0x1b6   : > { %p2410_p1 = por %p2409_p11, %p2408_p5 }
 0x1b7   : > { %p2406_p0 = pneg %p2405_p2 }
 0x1b8   : > { %p2412_p6 = por %p2411_p4, %p2410_p1 }
 0x1ba   : > { %p2413_p8 = pnand %p2412_p6, %p2406_p0 }
 0x1bc   : > { %2416 = shalt.err (!%p2413_p8)
}
 0x1bd   : > { %s2529_s28 = smov 64   ;;  %s2530_s24 = smov 4  }
 0x1be   : > { %2215 = dma.vmem_to_hbm [thread:$0]  (%p2651_p12), %s2819_s11, 2048, %s2817_s12, %s1377_s20, %s2529_s28, %s2529_s28, %s2530_s24  }
 0x1bf   : > { %s2960_s21 = sand.u32 1, %s2579_s19   ;;  %s2417_s10 = scalar_lea.vmem %s2826_s6, 2048 }
 0x1c0   : > { %s2868_s23 = scalar_lea.sflag [#allocation9], %s2960_s21  ;;  %p2418_p10 = scmp.ne.s32.totalorder %s2826_s6, %s2417_s10 }
 0x1c1   : > { %s2531_s29 = smov [#allocation8]  }
 0x1c2   : > { %p2419_p13 = pnand %p2418_p10, %p2651_p12  ;;  %s2421_s8 = sshll.u32 %s2531_s29, 4  ;;  %s2422_s8 = int_to_ptr.vmem [resolvable:$false] %s2421_s8 }
 0x1c3   : > { %s2423_s9 = scalar_lea.vmem %s2422_s8, 4096  ;;  %p2424_p7 = scmp.lt.s32.totalorder %s2826_s6, %s2422_s8 }
 0x1c4   : > { %p2420_p3 = pneg %p2419_p13  ;;  %p2425_p9 = scmp.lt.s32.totalorder %s2423_s9, %s2417_s10 }
 0x1c6   : > { %p2426_p2 = por %p2425_p9, %p2424_p7 }
 0x1c8   : > { %p2427_p0 = pnand %p2426_p2, %p2420_p3 }
 0x1ca   : > { %2430 = shalt.err (!%p2427_p0)
}
 0x1cb   : > { %s2431_s19 = scalar_lea.hbm %s2824_s7, 2048  ;;  %s2435_s11 = scalar_lea.hbm %s2943_s3, 4096 }
 0x1cc   : > { %p2432_p5 = scmp.ne.s32.totalorder %s2824_s7, %s2431_s19  ;;  %p2436_p4 = scmp.lt.u32.totalorder %s2824_s7, %s2943_s3 }
 0x1cd   : > { %p2437_p6 = scmp.lt.u32.totalorder %s2435_s11, %s2431_s19  ;;  %p2439_p10 = scmp.lt.u32.totalorder %s2431_s19, %s2824_s7 }
 0x1ce   : > { %p2433_p11 = pnand %p2432_p5, %p2651_p12 }
 0x1cf   : > { %p2438_p8 = por %p2437_p6, %p2436_p4 }
 0x1d0   : > { %p2434_p1 = pneg %p2433_p11 }
 0x1d1   : > { %p2440_p13 = por %p2439_p10, %p2438_p8 }
 0x1d3   : > { %p2441_p3 = pnand %p2440_p13, %p2434_p1 }
 0x1d5   : > { %2444 = shalt.err (!%p2441_p3)
}
 0x1d6   : > { %2216 = dma.vmem_to_hbm [thread:$0]  (%p2651_p12), %s2826_s6, 2048, %s2824_s7, %s2868_s23, %s2529_s28, %s2529_s28, %s2530_s24  }
 0x1d7   : > { %s2445_s21 = scalar_lea.vmem %s2835_s26, 2048  ;;  %s2532_s10 = smov [#allocation10]  }
 0x1d8   : > { %p2446_p7 = scmp.ne.s32.totalorder %s2835_s26, %s2445_s21  ;;  %s2449_s29 = sshll.u32 %s2532_s10, 4  ;;  %s2450_s29 = int_to_ptr.vmem [resolvable:$false] %s2449_s29 }
 0x1d9   : > { %s2451_s8 = scalar_lea.vmem %s2450_s29, 4096  ;;  %p2452_p0 = scmp.lt.s32.totalorder %s2835_s26, %s2450_s29 }
 0x1da   : > { %p2447_p9 = pnand %p2446_p7, %p2651_p12  ;;  %p2453_p5 = scmp.lt.s32.totalorder %s2451_s8, %s2445_s21 }
 0x1dc   : > { %p2448_p2 = pneg %p2447_p9  ;;  %p2454_p11 = por %p2453_p5, %p2452_p0 }
 0x1de   : > { %p2455_p1 = pnand %p2454_p11, %p2448_p2 }
 0x1e0   : > { %2458 = shalt.err (!%p2455_p1)
}
 0x1e1   : > { %s2459_s6 = scalar_lea.hbm %s2833_s25, 2048  ;;  %s2463_s19 = scalar_lea.hbm %s2944_s4, 4096 }
 0x1e2   : > { %p2460_p4 = scmp.ne.s32.totalorder %s2833_s25, %s2459_s6  ;;  %p2464_p10 = scmp.lt.u32.totalorder %s2833_s25, %s2944_s4 }
 0x1e3   : > { %p2465_p13 = scmp.lt.u32.totalorder %s2463_s19, %s2459_s6  ;;  %p2467_p7 = scmp.lt.u32.totalorder %s2459_s6, %s2833_s25 }
 0x1e4   : > { %p2461_p6 = pnand %p2460_p4, %p2651_p12 }
 0x1e5   : > { %p2466_p3 = por %p2465_p13, %p2464_p10 }
 0x1e6   : > { %p2462_p8 = pneg %p2461_p6 }
 0x1e7   : > { %p2468_p9 = por %p2467_p7, %p2466_p3 }
 0x1e9   : > { %p2469_p2 = pnand %p2468_p9, %p2462_p8 }
 0x1eb   : > { %2472 = shalt.err (!%p2469_p2)
}
 0x1ec   : > { %2217 = dma.vmem_to_hbm [thread:$0]  (%p2651_p12), %s2835_s26, 2048, %s2833_s25, %s2868_s23, %s2529_s28, %s2529_s28, %s2530_s24  }
 0x1ed PF: > { %s1447_s11 = sand.u32 1, %s2507_s15   ;;  %p2961_p0 = scmp.ne.s32.totalorder %s2950_s22, 0 }
 0x1ee   : > { %p2962_p5 = scmp.ge.s32.totalorder %s2519_s18, 2  ;;  %s1448_s12 = scalar_lea.sflag [#allocation4], %s1447_s11 }
 0x1f0   : > { %p2230_p11 = pnand %p2962_p5, %p2961_p0 }
 0x1f2   : > { %2498 = dma.done.wait (!%p2230_p11), %s1448_s12, 2048  }
 0x1f3   : > { %2500 = vsyncadd (!%p2230_p11), %s1448_s12, 4294965248  ;;  %s2963_s5 = sadd.s32 4294967294, %s2519_s18  }
 0x1f4   : > { %s1456_s13 = sand.u32 1, %s2963_s5  }
 0x1f5   : > { %s1457_s21 = scalar_lea.sflag [#allocation9], %s1456_s13 }
 0x1f6   : > { %2502 = dma.done.wait (!%p2230_p11), %s1457_s21, 4096  }
 0x1f7   : > { %2504 = vsyncadd (!%p2230_p11), %s1457_s21, 4294963200  ;;  %p22_p12 = scmp.ge.s32.totalorder %s2616_s27, 4   ;;  %s2964_s15 = smov %s2511_s16 }
 0x1f8   : > { %s2965_s16 = smov %s2515_s17  ;;  %s2966_s17 = smov %s2647_s30 }
 0x1f9   : > { %s2967_s18 = smov %s2616_s27  ;;  %24 = sbr.rel (!%p22_p12) target bundleno = 8 (0x8), region = 109 }
 0x200   :  { %1471 = vsyncpa [#allocation3], 1 }
 0x201   :  { %1473 = vsyncpa [#allocation3 + $0x1], 1 }
 0x202   :  { %1474 = vsyncpa [#allocation6], 1 }
 0x203   :  { %1475 = vsyncpa [#allocation4], 1 }
 0x204   :  { %1477 = vsyncpa [#allocation4 + $0x1], 1 }
 0x205   :  { %1478 = vsyncpa [#allocation9], 1 }
 0x206   :  { %1480 = vsyncpa [#allocation9 + $0x1], 1 }

</bundles_post_ra>
